<compile_context>
chip_gen: v7x
topology: tpu7x:2x2x1
jax: 0.10.0
libtpu: 0.0.40
codegen_flags: <defaults>
</compile_context>

<pallas_src>
import functools

import jax
import jax.numpy as jnp
import numpy as np
from jax import lax
from jax.experimental import pallas as pl
from jax.experimental.pallas import tpu as pltpu


def _round_up(x, m):
    return ((x + m - 1) // m) * m


def _pick_vmem_limit():
    """min(100 MiB, 80% of physical VMEM); 64 MiB fallback if unknown."""
    try:
        cap = int(pltpu.get_tpu_info().vmem_capacity_bytes)
    except Exception:
        return 64 * 1024 * 1024
    return int(min(100 * 1024 * 1024, (cap * 4) // 5))


# ---------------------------------------------------------------------------
# Phase 1: fused Q/K/V 1x1 projection + transposed layouts.
# ---------------------------------------------------------------------------
def _ccnet_project_kernel(x_ref, w_ref, b_ref,
                          qk_ref, v_ref, qkT_ref, vT_ref, *, Cq2):
    """Grid = (batch, row_tile).

    x_ref  : (1, tH, W, C)     f32 input row tile (zero-padded rows beyond H)
    w_ref  : (C, 2*Cq + C)     bf16 fused [Wq | Wk | Wv] (pre-transposed)
    b_ref  : (1, 2*Cq + C)     f32 fused [bq | bk | bv]
    qk_ref : (1, tH, W, 2*Cq)  bf16 lane-packed [q | k], natural layout
    v_ref  : (1, tH, W, C)     bf16 v, natural layout
    qkT_ref: (1, W, tH, 2*Cq)  bf16 [q | k], (W, H, c) layout
    vT_ref : (1, W, tH, C)     bf16 v, (W, H, c) layout
    """
    x = x_ref[0].astype(jnp.bfloat16)                         # (tH, W, C)
    qkv = jnp.einsum('hwc,cd->hwd', x, w_ref[...],
                     preferred_element_type=jnp.float32)
    qkv = qkv + b_ref[...].reshape(1, 1, -1)                  # (tH, W, 2Cq+C)
    qk = qkv[..., :Cq2].astype(jnp.bfloat16)
    v = qkv[..., Cq2:].astype(jnp.bfloat16)
    qk_ref[0] = qk
    v_ref[0] = v
    # One-time (h, w, c) -> (w, h, c) relayouts so the H-path matmuls in phase
    # 2 are batch-major (no per-tile transposes there).
    qkT_ref[0] = jnp.transpose(qk, (1, 0, 2))
    vT_ref[0] = jnp.transpose(v, (1, 0, 2))


# ---------------------------------------------------------------------------
# Phase 2: criss-cross attention over row tiles.
# ---------------------------------------------------------------------------
def _ccnet_attn_kernel(qk_ref, qkT_ref, v_ref, vT_ref, x_ref, gamma_ref, o_ref,
                       *, H, Cq, tH):
    """Grid = (batch, row_tile); both axes are 'parallel'.

    qk_ref  : (1, tH, W, 2*Cq) bf16  [q | k] for this row tile
    qkT_ref : (1, W, Hp, 2*Cq) bf16  [q | k]^T, resident per batch
    v_ref   : (1, tH, W, C)    bf16  v for this row tile
    vT_ref  : (1, W, Hp, C)    bf16  v^T, resident per batch
    x_ref   : (1, tH, W, C)    f32   residual row tile
    gamma_ref: (1,)            f32   in SMEM
    o_ref   : (1, tH, W, C)    f32   output row tile
    """
    r = pl.program_id(1)
    row0 = pl.multiple_of(r * tH, tH)
    Hp = qkT_ref.shape[2]

    qk_tile = qk_ref[0]                                       # (tH, W, 2Cq)
    q_tile = qk_tile[..., :Cq]                                 # (tH, W, Cq)
    k_tile = qk_tile[..., Cq:]                                 # (tH, W, Cq)
    v_tile = v_ref[0]                                          # (tH, W, C)

    qT_tile = qkT_ref[0, :, pl.ds(row0, tH), :][..., :Cq]      # (W, tH, Cq)
    kT_full = qkT_ref[0][..., Cq:]                             # (W, Hp, Cq)
    vT_full = vT_ref[0]                                        # (W, Hp, C)

    # Column (H-path) energies, batched over w (major axis):
    #   e_hT[w, i, j] = sum_c q[row0 + i, w, c] * k[j, w, c]
    e_hT = jnp.einsum('wic,wjc->wij', qT_tile, kT_full,
                      preferred_element_type=jnp.float32)      # (W, tH, Hp)
    # Additive mask: the self pixel is excluded from the vertical path and the
    # zero-padded key rows (j >= H) must never be attended to.
    gi = row0 + lax.broadcasted_iota(jnp.int32, (tH, Hp), 0)
    gj = lax.broadcasted_iota(jnp.int32, (tH, Hp), 1)
    mask = jnp.where((gi == gj) | (gj >= H), -1e30, 0.0).astype(jnp.float32)
    e_hT = e_hT + mask[None, :, :]

    # Row (W-path) energies, batched over the tile row (major axis):
    #   e_w[h, i, j] = sum_c q[row0 + h, i, c] * k[row0 + h, j, c]
    e_w = jnp.einsum('hic,hjc->hij', q_tile, k_tile,
                     preferred_element_type=jnp.float32)       # (tH, W, W)

    # Joint softmax over the concatenated (H + W) axis, deferred normalization.
    # INVARIANT: the -1e30 mask is safe only because the joint max always
    # includes the finite W-path row max, so exp(masked - max) underflows to 0.
    m_hT = jnp.max(e_hT, axis=-1)                              # (W, tH)
    m_w = jnp.max(e_w, axis=-1)                                # (tH, W)
    m_T = jnp.maximum(m_hT, jnp.transpose(m_w))                # (W, tH)
    m_nat = jnp.transpose(m_T)                                 # (tH, W)

    # bf16 probabilities (halves the largest per-tile intermediates); the
    # shared denominator is accumulated in f32.
    p_hT = jnp.exp(e_hT - m_T[:, :, None]).astype(jnp.bfloat16)   # (W, tH, Hp)
    p_w = jnp.exp(e_w - m_nat[:, :, None]).astype(jnp.bfloat16)   # (tH, W, W)
    denom = (jnp.transpose(jnp.sum(p_hT.astype(jnp.float32), axis=-1))
             + jnp.sum(p_w.astype(jnp.float32), axis=-1))          # (tH, W)

    # Un-normalized aggregation against V (bf16 MXU, f32 accumulate).
    out_hT = jnp.einsum('wij,wjc->wic', p_hT, vT_full,
                        preferred_element_type=jnp.float32)    # (W, tH, C)
    out = jnp.transpose(out_hT, (1, 0, 2))                     # (tH, W, C)
    out = out + jnp.einsum('hij,hjc->hic', p_w, v_tile,
                           preferred_element_type=jnp.float32)

    # TODO(synk): add one Newton step on the reciprocal if tighter-than-2e-2
    # parity with the PyTorch module is ever required.
    inv = pl.reciprocal(denom, approx=True)[:, :, None]        # (tH, W, 1)
    gamma = gamma_ref[0]
    o_ref[0] = (gamma * out * inv + x_ref[0]).astype(o_ref.dtype)


# ---------------------------------------------------------------------------
# Public wrapper (PyTorch-style NCHW in / NCHW out).
# ---------------------------------------------------------------------------
def criss_cross_attention(x_nchw, params, *, row_tile=32, vmem_limit_bytes=None):
    """Pallas implementation of CrissCrossAttention.forward (NCHW in/out)."""
    B, C, H, W = x_nchw.shape
    Cq = C // 8
    assert Cq >= 1, "in_dim must be >= 8"
    Cq2 = 2 * Cq

    # Row-tile policy: tH is a multiple of 8; H is zero-padded up to a multiple
    # of tH (padded key rows are masked inside the attention kernel).
    tH = _round_up(min(row_tile, _round_up(H, 8)), 8)
    Hp = _round_up(H, tH)
    nR = Hp // tH

    if vmem_limit_bytes is None:
        vmem_limit_bytes = _pick_vmem_limit()

    x_nhwc = jnp.transpose(x_nchw, (0, 2, 3, 1)).astype(jnp.float32)
    if Hp != H:
        x_nhwc = jnp.pad(x_nhwc, ((0, 0), (0, Hp - H), (0, 0), (0, 0)))

    # Fused projection weight/bias: columns are [q | k | v].
    w_all = jnp.concatenate(
        [jnp.transpose(params['wq']),
         jnp.transpose(params['wk']),
         jnp.transpose(params['wv'])], axis=1).astype(jnp.bfloat16)  # (C, 2Cq+C)
    b_all = jnp.concatenate(
        [params['bq'], params['bk'], params['bv']]).reshape(1, -1).astype(jnp.float32)
    gamma = params['gamma'].reshape(1).astype(jnp.float32)

    # ---- Phase 1: fused Q/K/V projection (both layouts written to HBM) ------
    proj_kernel = functools.partial(_ccnet_project_kernel, Cq2=Cq2)
    qk_nat, v_nat, qkT, vT = pl.pallas_call(
        proj_kernel,
        out_shape=(
            jax.ShapeDtypeStruct((B, Hp, W, Cq2), jnp.bfloat16),   # [q|k] natural
            jax.ShapeDtypeStruct((B, Hp, W, C), jnp.bfloat16),     # v natural
            jax.ShapeDtypeStruct((B, W, Hp, Cq2), jnp.bfloat16),   # [q|k]^T
            jax.ShapeDtypeStruct((B, W, Hp, C), jnp.bfloat16),     # v^T
        ),
        grid_spec=pltpu.PrefetchScalarGridSpec(
            num_scalar_prefetch=0,
            grid=(B, nR),
            in_specs=[
                pl.BlockSpec((1, tH, W, C), lambda b, r: (b, r, 0, 0)),
                pl.BlockSpec((C, Cq2 + C), lambda b, r: (0, 0)),
                pl.BlockSpec((1, Cq2 + C), lambda b, r: (0, 0)),
            ],
            out_specs=[
                pl.BlockSpec((1, tH, W, Cq2), lambda b, r: (b, r, 0, 0)),
                pl.BlockSpec((1, tH, W, C), lambda b, r: (b, r, 0, 0)),
                pl.BlockSpec((1, W, tH, Cq2), lambda b, r: (b, 0, r, 0)),
                pl.BlockSpec((1, W, tH, C), lambda b, r: (b, 0, r, 0)),
            ],
        ),
        compiler_params=pltpu.CompilerParams(
            dimension_semantics=("parallel", "parallel"),
            vmem_limit_bytes=vmem_limit_bytes),
    )(x_nhwc, w_all, b_all)

    # ---- Phase 2: criss-cross attention over row tiles ----------------------
    attn_kernel = functools.partial(_ccnet_attn_kernel, H=H, Cq=Cq, tH=tH)
    out_nhwc = pl.pallas_call(
        attn_kernel,
        out_shape=jax.ShapeDtypeStruct((B, Hp, W, C), jnp.float32),
        grid_spec=pltpu.PrefetchScalarGridSpec(
            num_scalar_prefetch=0,
            grid=(B, nR),
            in_specs=[
                pl.BlockSpec((1, tH, W, Cq2), lambda b, r: (b, r, 0, 0)),  # [q|k] tile
                pl.BlockSpec((1, W, Hp, Cq2), lambda b, r: (b, 0, 0, 0)),  # [q|k]^T resident
                pl.BlockSpec((1, tH, W, C), lambda b, r: (b, r, 0, 0)),    # v tile
                pl.BlockSpec((1, W, Hp, C), lambda b, r: (b, 0, 0, 0)),    # v^T resident
                pl.BlockSpec((1, tH, W, C), lambda b, r: (b, r, 0, 0)),    # residual x tile
                pl.BlockSpec(memory_space=pltpu.MemorySpace.SMEM),         # gamma
            ],
            out_specs=pl.BlockSpec((1, tH, W, C), lambda b, r: (b, r, 0, 0)),
        ),
        compiler_params=pltpu.CompilerParams(
            dimension_semantics=("parallel", "parallel"),
            vmem_limit_bytes=vmem_limit_bytes),
    )(qk_nat, qkT, v_nat, vT, x_nhwc, gamma)

    out_nhwc = out_nhwc[:, :H]
    return jnp.transpose(out_nhwc, (0, 3, 1, 2))


# ---------------------------------------------------------------------------
# Pure-JAX reference (mirrors the PyTorch module exactly).
# ---------------------------------------------------------------------------
def criss_cross_attention_reference(x, params):
    B, C, H, W = x.shape
    wq, bq = params['wq'], params['bq']
    wk, bk = params['wk'], params['bk']
    wv, bv = params['wv'], params['bv']
    gamma = params['gamma'][0]

    q = jnp.einsum('oc,bchw->bohw', wq, x) + bq[None, :, None, None]
    k = jnp.einsum('oc,bchw->bohw', wk, x) + bk[None, :, None, None]
    v = jnp.einsum('oc,bchw->bohw', wv, x) + bv[None, :, None, None]

    e_h = jnp.einsum('bciw,bcjw->biwj', q, k)            # (B, H, W, H)
    diag = jnp.eye(H, dtype=bool)[:, None, :]            # (H, 1, H)
    e_h = jnp.where(diag[None], -jnp.inf, e_h)
    e_w = jnp.einsum('bchi,bchj->bhij', q, k)            # (B, H, W, W)

    e = jnp.concatenate([e_h, e_w], axis=-1)
    att = jax.nn.softmax(e, axis=-1)
    att_h, att_w = att[..., :H], att[..., H:]

    out_h = jnp.einsum('bcjw,biwj->bciw', v, att_h)
    out_w = jnp.einsum('bchj,bhij->bchi', v, att_w)
    return gamma * (out_h + out_w) + x


def init_params(key, in_dim):
    """Deterministic parameter init matching CrissCrossAttention.__init__ shapes."""
    cq = in_dim // 8
    ks = jax.random.split(key, 6)
    params = {
        'wq': 0.1 * jax.random.normal(ks[0], (cq, in_dim), jnp.float32),
        'bq': 0.1 * jax.random.normal(ks[1], (cq,), jnp.float32),
        'wk': 0.1 * jax.random.normal(ks[2], (cq, in_dim), jnp.float32),
        'bk': 0.1 * jax.random.normal(ks[3], (cq,), jnp.float32),
        'wv': 0.1 * jax.random.normal(ks[4], (in_dim, in_dim), jnp.float32),
        'bv': 0.1 * jax.random.normal(ks[5], (in_dim,), jnp.float32),
        # nn.Parameter(torch.zeros(1)) in the module; 0.5 here so the attention
        # path actually contributes to the output under test (do not ship as-is).
        'gamma': jnp.array([0.5], jnp.float32),
    }
    return params


if __name__ == "__main__":
    key = jax.random.PRNGKey(0)
    kx, kp, kx2 = jax.random.split(key, 3)

    # Case 1: H divisible by the row tile (row_tile=8 -> 2 row tiles / image).
    B, C, H, W = 2, 16, 16, 16   # in_dim=16 -> query/key channels Cq = 2
    x = jax.random.normal(kx, (B, C, H, W), jnp.float32)
    params = init_params(kp, C)
    out = jax.block_until_ready(criss_cross_attention(x, params, row_tile=8))
    ref = jax.block_until_ready(criss_cross_attention_reference(x, params))
    np.testing.assert_allclose(np.asarray(out), np.asarray(ref),
                               rtol=2e-2, atol=2e-2)

    # Case 2: H not a multiple of the row tile (exercises padding + masking,
    # the "prime H" production cliff called out in the review).
    B2, C2, H2, W2 = 1, 16, 13, 12
    x2 = jax.random.normal(kx2, (B2, C2, H2, W2), jnp.float32)
    out2 = jax.block_until_ready(criss_cross_attention(x2, params, row_tile=8))
    ref2 = jax.block_until_ready(criss_cross_attention_reference(x2, params))
    np.testing.assert_allclose(np.asarray(out2), np.asarray(ref2),
                               rtol=2e-2, atol=2e-2)

    print("KERNEL_OK")
</pallas_src>

<mosaic_0001>
module attributes {stable_mosaic.version = 11 : i64} {
  func.func @_ccnet_project_kernel(%arg0: i32, %arg1: i32, %arg2: memref<1x8x16x16xf32, #tpu.memory_space<vmem>>, %arg3: memref<16x20xbf16, #tpu.memory_space<vmem>>, %arg4: memref<1x20xf32, #tpu.memory_space<vmem>>, %arg5: memref<1x8x16x4xbf16, #tpu.memory_space<vmem>>, %arg6: memref<1x8x16x16xbf16, #tpu.memory_space<vmem>>, %arg7: memref<1x16x8x4xbf16, #tpu.memory_space<vmem>>, %arg8: memref<1x16x8x16xbf16, #tpu.memory_space<vmem>>) attributes {dimension_semantics = [#tpu.dimension_semantics<parallel>, #tpu.dimension_semantics<parallel>], iteration_bounds = array<i64: 2, 2>, scalar_prefetch = 0 : i64, scratch_operands = 0 : i64, tpu.core_type = #tpu.core_type<tc>, window_params = [{transform_indices = @transform_0, window_bounds = array<i64: 1, 8, 16, 16>}, {pipeline_mode = #tpu.pipeline_mode<synchronous>, transform_indices = @transform_1, window_bounds = array<i64: 16, 20>}, {pipeline_mode = #tpu.pipeline_mode<synchronous>, transform_indices = @transform_2, window_bounds = array<i64: 1, 20>}, {transform_indices = @transform_3, window_bounds = array<i64: 1, 8, 16, 4>}, {transform_indices = @transform_4, window_bounds = array<i64: 1, 8, 16, 16>}, {transform_indices = @transform_5, window_bounds = array<i64: 1, 16, 8, 4>}, {transform_indices = @transform_6, window_bounds = array<i64: 1, 16, 8, 16>}]} {
    %c0 = arith.constant 0 : index
    %c0_0 = arith.constant 0 : index
    %c0_1 = arith.constant 0 : index
    %c0_2 = arith.constant 0 : index
    %0 = vector.load %arg2[%c0, %c0_0, %c0_1, %c0_2] : memref<1x8x16x16xf32, #tpu.memory_space<vmem>>, vector<1x8x16x16xf32>
    %1 = vector.shape_cast %0 : vector<1x8x16x16xf32> to vector<8x16x16xf32>
    %2 = arith.truncf %1 : vector<8x16x16xf32> to vector<8x16x16xbf16>
    %c0_3 = arith.constant 0 : index
    %c0_4 = arith.constant 0 : index
    %3 = vector.load %arg3[%c0_3, %c0_4] : memref<16x20xbf16, #tpu.memory_space<vmem>>, vector<16x20xbf16>
    "tpu.trace_start"() <{level = 10 : i32, message = "hwc,cd->hwd"}> : () -> ()
    %cst = arith.constant dense<0.000000e+00> : vector<8x16x20xf32>
    %4 = tpu.matmul %2, %3, %cst {dimension_numbers = #tpu.dot_dimension_numbers<[2], [0], [0, 1], [1], [0, 0, 0, 1, 1, 1], [], []>} : vector<8x16x16xbf16>, vector<16x20xbf16>, vector<8x16x20xf32> -> vector<8x16x20xf32>
    "tpu.trace_stop"() : () -> ()
    %c0_5 = arith.constant 0 : index
    %c0_6 = arith.constant 0 : index
    %5 = vector.load %arg4[%c0_5, %c0_6] : memref<1x20xf32, #tpu.memory_space<vmem>>, vector<1x20xf32>
    %6 = vector.shape_cast %5 : vector<1x20xf32> to vector<1x1x20xf32>
    %7 = vector.broadcast %6 : vector<1x1x20xf32> to vector<8x16x20xf32>
    %8 = arith.addf %4, %7 : vector<8x16x20xf32>
    %9 = vector.extract_strided_slice %8 {offsets = [0, 0, 0], sizes = [8, 16, 4], strides = [1, 1, 1]} : vector<8x16x20xf32> to vector<8x16x4xf32>
    %10 = arith.truncf %9 : vector<8x16x4xf32> to vector<8x16x4xbf16>
    %11 = vector.extract_strided_slice %8 {offsets = [0, 0, 4], sizes = [8, 16, 16], strides = [1, 1, 1]} : vector<8x16x20xf32> to vector<8x16x16xf32>
    %12 = arith.truncf %11 : vector<8x16x16xf32> to vector<8x16x16xbf16>
    %c0_7 = arith.constant 0 : index
    %c0_8 = arith.constant 0 : index
    %c0_9 = arith.constant 0 : index
    %c0_10 = arith.constant 0 : index
    %13 = vector.load %arg5[%c0_7, %c0_8, %c0_9, %c0_10] : memref<1x8x16x4xbf16, #tpu.memory_space<vmem>>, vector<1x8x16x4xbf16>
    %14 = vector.shape_cast %13 : vector<1x8x16x4xbf16> to vector<8x16x4xbf16>
    %15 = vector.shape_cast %10 : vector<8x16x4xbf16> to vector<1x8x16x4xbf16>
    tpu.vector_store %arg5[%c0_7, %c0_8, %c0_9, %c0_10], %15 {strides = array<i32>} : memref<1x8x16x4xbf16, #tpu.memory_space<vmem>>, vector<1x8x16x4xbf16>,
    %c0_11 = arith.constant 0 : index
    %c0_12 = arith.constant 0 : index
    %c0_13 = arith.constant 0 : index
    %c0_14 = arith.constant 0 : index
    %16 = vector.load %arg6[%c0_11, %c0_12, %c0_13, %c0_14] : memref<1x8x16x16xbf16, #tpu.memory_space<vmem>>, vector<1x8x16x16xbf16>
    %17 = vector.shape_cast %16 : vector<1x8x16x16xbf16> to vector<8x16x16xbf16>
    %18 = vector.shape_cast %12 : vector<8x16x16xbf16> to vector<1x8x16x16xbf16>
    tpu.vector_store %arg6[%c0_11, %c0_12, %c0_13, %c0_14], %18 {strides = array<i32>} : memref<1x8x16x16xbf16, #tpu.memory_space<vmem>>, vector<1x8x16x16xbf16>,
    %19 = tpu.transpose %10, [1, 0, 2] : vector<8x16x4xbf16> -> vector<16x8x4xbf16>
    %c0_15 = arith.constant 0 : index
    %c0_16 = arith.constant 0 : index
    %c0_17 = arith.constant 0 : index
    %c0_18 = arith.constant 0 : index
    %20 = vector.load %arg7[%c0_15, %c0_16, %c0_17, %c0_18] : memref<1x16x8x4xbf16, #tpu.memory_space<vmem>>, vector<1x16x8x4xbf16>
    %21 = vector.shape_cast %20 : vector<1x16x8x4xbf16> to vector<16x8x4xbf16>
    %22 = vector.shape_cast %19 : vector<16x8x4xbf16> to vector<1x16x8x4xbf16>
    tpu.vector_store %arg7[%c0_15, %c0_16, %c0_17, %c0_18], %22 {strides = array<i32>} : memref<1x16x8x4xbf16, #tpu.memory_space<vmem>>, vector<1x16x8x4xbf16>,
    %23 = tpu.transpose %12, [1, 0, 2] : vector<8x16x16xbf16> -> vector<16x8x16xbf16>
    %c0_19 = arith.constant 0 : index
    %c0_20 = arith.constant 0 : index
    %c0_21 = arith.constant 0 : index
    %c0_22 = arith.constant 0 : index
    %24 = vector.load %arg8[%c0_19, %c0_20, %c0_21, %c0_22] : memref<1x16x8x16xbf16, #tpu.memory_space<vmem>>, vector<1x16x8x16xbf16>
    %25 = vector.shape_cast %24 : vector<1x16x8x16xbf16> to vector<16x8x16xbf16>
    %26 = vector.shape_cast %23 : vector<16x8x16xbf16> to vector<1x16x8x16xbf16>
    tpu.vector_store %arg8[%c0_19, %c0_20, %c0_21, %c0_22], %26 {strides = array<i32>} : memref<1x16x8x16xbf16, #tpu.memory_space<vmem>>, vector<1x16x8x16xbf16>,
    return
  }
  func.func @transform_0(%arg0: i32, %arg1: i32) -> (i32, i32, i32, i32) {
    %c0_i32 = arith.constant 0 : i32
    %c0_i32_0 = arith.constant 0 : i32
    %c0_i32_1 = arith.constant 0 : i32
    return %arg0, %arg1, %c0_i32, %c0_i32_0 : i32, i32, i32, i32
  }
  func.func @transform_1(%arg0: i32, %arg1: i32) -> (i32, i32) {
    %c0_i32 = arith.constant 0 : i32
    %c0_i32_0 = arith.constant 0 : i32
    %c0_i32_1 = arith.constant 0 : i32
    return %c0_i32, %c0_i32_0 : i32, i32
  }
  func.func @transform_2(%arg0: i32, %arg1: i32) -> (i32, i32) {
    %c0_i32 = arith.constant 0 : i32
    %c0_i32_0 = arith.constant 0 : i32
    %c0_i32_1 = arith.constant 0 : i32
    return %c0_i32, %c0_i32_0 : i32, i32
  }
  func.func @transform_3(%arg0: i32, %arg1: i32) -> (i32, i32, i32, i32) {
    %c0_i32 = arith.constant 0 : i32
    %c0_i32_0 = arith.constant 0 : i32
    %c0_i32_1 = arith.constant 0 : i32
    return %arg0, %arg1, %c0_i32, %c0_i32_0 : i32, i32, i32, i32
  }
  func.func @transform_4(%arg0: i32, %arg1: i32) -> (i32, i32, i32, i32) {
    %c0_i32 = arith.constant 0 : i32
    %c0_i32_0 = arith.constant 0 : i32
    %c0_i32_1 = arith.constant 0 : i32
    return %arg0, %arg1, %c0_i32, %c0_i32_0 : i32, i32, i32, i32
  }
  func.func @transform_5(%arg0: i32, %arg1: i32) -> (i32, i32, i32, i32) {
    %c0_i32 = arith.constant 0 : i32
    %c0_i32_0 = arith.constant 0 : i32
    %c0_i32_1 = arith.constant 0 : i32
    return %arg0, %c0_i32, %arg1, %c0_i32_0 : i32, i32, i32, i32
  }
  func.func @transform_6(%arg0: i32, %arg1: i32) -> (i32, i32, i32, i32) {
    %c0_i32 = arith.constant 0 : i32
    %c0_i32_0 = arith.constant 0 : i32
    %c0_i32_1 = arith.constant 0 : i32
    return %arg0, %c0_i32, %arg1, %c0_i32_0 : i32, i32, i32, i32
  }
}

</mosaic_0001>

<bundles_post_ra>
// kernel: tpu_custom_call.1
= control target key start
LH: loop header
LB: loop body
LE: loop exit
PB: predicated region body
PF: predicated region fallthrough
CT: control target
= control target key end

     0   :  { %s2665_s0 = inlined_call_operand.hbm [shape: f32[2,16,16,16], index: 0, kind: input, shape index: {}]   ;;  %s2666_s1 = inlined_call_operand.hbm [shape: bf16[16,20], index: 1, kind: input, shape index: {}]   ;;  %s2667_s2 = inlined_call_operand.hbm [shape: f32[1,20], index: 2, kind: input, shape index: {}]   ;;  %s2668_s3 = inlined_call_operand.hbm [shape: bf16[2,16,16,4], index: 3, kind: output, shape index: {0}]   ;;  %s2669_s4 = inlined_call_operand.hbm [shape: bf16[2,16,16,16], index: 4, kind: output, shape index: {1}]   ;;  %s2670_s5 = inlined_call_operand.hbm [shape: bf16[2,16,16,4], index: 5, kind: output, shape index: {2}]   ;;  %s2671_s6 = inlined_call_operand.hbm [shape: bf16[2,16,16,16], index: 6, kind: output, shape index: {3}]  }
   0x1   :  { %2686 = sst [smem:[#allocation22_spill]] %s2665_s0 }
   0x2   :  { %2687 = sst [smem:[#allocation23_spill]] %s2666_s1 }
   0x3   :  { %2688 = sst [smem:[#allocation24_spill]] %s2667_s2 }
   0x4   :  { %2689 = sst [smem:[#allocation25_spill]] %s2668_s3 }
   0x5   :  { %2690 = sst [smem:[#allocation26_spill]] %s2669_s4 }
   0x6   :  { %2691 = sst [smem:[#allocation27_spill]] %s2670_s5 }
   0x7   :  { %2692 = sst [smem:[#allocation28_spill]] %s2671_s6 }
   0x8   :  { %12 = vsyncpa [#allocation3], 0 }
   0x9   :  { %14 = vsyncpa [#allocation3 + $0x1], 0 }
   0xa   :  { %15 = vsyncpa [#allocation6], 0 }
   0xb   :  { %16 = vsyncpa [#allocation4], 0 }
   0xc   :  { %18 = vsyncpa [#allocation4 + $0x1], 0 }
   0xd   :  { %19 = vsyncpa [#allocation10], 0 }
   0xe   :  { %21 = vsyncpa [#allocation10 + $0x1], 0 }
   0xf   :  { %22 = vsyncpa [#allocation13], 0 }
  0x10   :  { %24 = vsyncpa [#allocation13 + $0x1], 0  ;;  %s1911_s21 = smov 0   ;;  %s1913_s22 = smov 0  }
  0x11   :  { %s1915_s23 = smov 0   ;;  %s1917_s24 = smov 0  }
  0x12   :  { %s1919_s25 = smov 0   ;;  %s1921_s26 = smov 0  }
  0x13   :  { %s1923_s27 = smov 0   ;;  %s1925_s28 = smov 0  }
  0x14 LB: > { %2693 = sst [smem:[#allocation19_spill]] %s1828_s21  ;;  %s1952_s29 = sadd.s32 4294967295, %s1856_s28   ;;  %s1856_s28 = sphi %s1925_s28, %s30_s28   ;;  %s1852_s27 = sphi %s1923_s27, %s2731_s27   ;;  %s1848_s26 = sphi %s1921_s26, %s2730_s26   ;;  %s1844_s25 = sphi %s1919_s25, %s2729_s25   ;;  %s1840_s24 = sphi %s1917_s24, %s2728_s24   ;;  %s1836_s23 = sphi %s1915_s23, %s2727_s23   ;;  %s1832_s22 = sphi %s1913_s22, %s2726_s22   ;;  %s1828_s21 = sphi %s1911_s21, %s2725_s21  }
  0x15   : > { %s2675_s30 = sadd.s32 4294967294, %s1856_s28   ;;  %p64_p0 = scmp.ne.s32.totalorder %s1832_s22, %s1828_s21 }
  0x16   : > { %p2672_p1 = scmp.eq.s32.totalorder %s1952_s29, 0  ;;  %p138_p3 = scmp.eq.s32.totalorder %s2675_s30, 3 }
  0x17   : > { %p1341_p5 = scmp.ge.s32.totalorder %s1856_s28, 1  ;;  %p229_p7 = scmp.lt.s32.totalorder %s1856_s28, 5 }
  0x18   : > { %p1963_p4 = por %p2672_p1, %p64_p0  ;;  %p1968_p6 = por %p138_p3, %p64_p0 }
  0x19   : > { %p1973_p8 = pnand %p1341_p5, %p229_p7  ;;  %s1858_s10 = smov [#allocation5]  }
  0x1a   : > { %s2694_s7 = scalar_select %p1963_p4, 1, 0 }
  0x1b   : > { %s2695_s8 = scalar_select %p1968_p6, 1, 0 }
  0x1c   : > { %s2697_s9 = scalar_select %p1973_p8, 1, 0 }
  0x1d   : > { %2696 = sst [smem:[#allocation20_spill]] %s2695_s8  ;;  %s241_s11 = sshll.u32 %s1858_s10, 4  ;;  %s242_s11 = int_to_ptr.vmem [resolvable:$true] %s241_s11 }
  0x1e   : > { %p1468_p9 = pneg %p1973_p8  ;;  %s1859_s13 = smov [#allocation7]  }
  0x1f   : > { %s255_s14 = sshll.u32 %s1859_s13, 4  ;;  %s2699_s1 = sld [smem:[#allocation23_spill]]  ;;  %s1985_s14 = int_to_ptr.vmem [resolvable:$true] %s255_s14 }
  0x20   : > { %p1981_p10 = pnand %p1468_p9, %p2672_p1 }
  0x22   : > { %p1578_p12 = pneg %p1981_p10 }
  0x25   : > { %s1576_s17 = scalar_lea.hbm %s2699_s1, 128 }
  0x26   : > { %p1577_p11 = scmp.ne.s32.totalorder %s2699_s1, %s1576_s17  ;;  %p1583_p3 = scmp.lt.u32.totalorder %s1576_s17, %s2699_s1 }
  0x28   : > { %p1579_p13 = pnand %p1578_p12, %p1577_p11 }
  0x2a   : > { %p1580_p0 = pneg %p1579_p13 }
  0x2c   : > { %p1585_p5 = pnand %p1583_p3, %p1580_p0 }
  0x2e   : > { %1588 = shalt.err (!%p1585_p5)
}
  0x2f   : > { %s1589_s13 = scalar_lea.vmem %s242_s11, 128  ;;  %p1597_p2 = scmp.lt.s32.totalorder %s242_s11, %s242_s11 }
  0x30   : > { %p1590_p7 = scmp.ne.s32.totalorder %s242_s11, %s1589_s13  ;;  %p1598_p6 = scmp.lt.s32.totalorder %s1589_s13, %s1589_s13 }
  0x32   : > { %p1592_p9 = pnand %p1590_p7, %p1578_p12  ;;  %p1599_p4 = por %p1598_p6, %p1597_p2 }
  0x34   : > { %p1593_p1 = pneg %p1592_p9 }
  0x36   : > { %p1600_p8 = pnand %p1599_p4, %p1593_p1 }
  0x38   : > { %1603 = shalt.err (!%p1600_p8)
}
  0x39   : > { %s1860_s15 = smov 64   ;;  %s1861_s16 = smov 4  }
  0x3a   : > { %1471 = dma.hbm_to_vmem [thread:$0]  (!%p1981_p10), %s2699_s1, 128, %s242_s11, [#allocation6], %s1860_s15, %s1860_s15, %s1861_s16  }
  0x3b   : > { %s2700_s2 = sld [smem:[#allocation24_spill]] }
  0x41   : > { %s1604_s10 = scalar_lea.hbm %s2700_s2, 16 }
  0x42   : > { %p1605_p11 = scmp.ne.s32.totalorder %s2700_s2, %s1604_s10  ;;  %p1611_p4 = scmp.lt.u32.totalorder %s1604_s10, %s2700_s2 }
  0x44   : > { %p1607_p1 = pnand %p1605_p11, %p1578_p12 }
  0x46   : > { %p1608_p2 = pneg %p1607_p1 }
  0x48   : > { %p1613_p6 = pnand %p1611_p4, %p1608_p2 }
  0x4a   : > { %1616 = shalt.err (!%p1613_p6)
}
  0x4b   : > { %s1617_s11 = scalar_lea.vmem %s1985_s14, 16  ;;  %s1624_s30 = scalar_lea.vmem %s1985_s14, 32 }
  0x4c   : > { %p1618_p8 = scmp.ne.s32.totalorder %s1985_s14, %s1617_s11  ;;  %p1625_p3 = scmp.lt.s32.totalorder %s1985_s14, %s1985_s14 }
  0x4d   : > { %p1626_p5 = scmp.lt.s32.totalorder %s1624_s30, %s1617_s11 }
  0x4e   : > { %p1620_p13 = pnand %p1618_p8, %p1578_p12 }
  0x4f   : > { %p1627_p7 = por %p1626_p5, %p1625_p3 }
  0x50   : > { %p1621_p0 = pneg %p1620_p13 }
  0x52   : > { %p1628_p9 = pnand %p1627_p7, %p1621_p0 }
  0x54   : > { %1631 = shalt.err (!%p1628_p9)
}
  0x55   : > { %1474 = dma.hbm_to_vmem [thread:$0]  (!%p1981_p10), %s2700_s2, 16, %s1985_s14, [#allocation6]  }
  0x56   : > { %s39_s15 = sadd.s32 1, %s1848_s26  ;;  %s42_s16 = sadd.s32 1, %s1852_s27 }
  0x57   : > { %p40_p12 = scmp.ge.s32.totalorder %s39_s15, 2  ;;  %s51_s12 = sadd.s32 1, %s1836_s23 }
  0x58   : > { %p58_p11 = scmp.ne.s32.totalorder %s1836_s23, %s1832_s22  ;;  %p59_p1 = scmp.eq.s32.totalorder %s1856_s28, 0 }
  0x59   : > { %s2733_s15 = smov (%p40_p12, %s39_s15), 0  ;;  %s2735_s16 = smov (!%p40_p12, %s42_s16), %s1852_s27 }
  0x5a   : > { %2701 = sst [smem:[#allocation21_spill]] %s2733_s15  ;;  %s47_s17 = ssub.s32 %s1848_s26, %s2733_s15 }
  0x5b   : > { %p2046_p2 = por %p59_p1, %p58_p11  ;;  %p44_p10 = scmp.ge.s32.totalorder %s2735_s16, 2 }
  0x5c   : > { %p2703_p4 = scmp.eq.s32.totalorder %s1952_s29, 3  ;;  %p1494_p8 = scmp.lt.s32.totalorder %s1856_s28, 4 }
  0x5d   : > { %s266_s19 = sand.u32 1, %s1836_s23   ;;  %s2737_s16 = smov (%p44_p10, %s2735_s16), 0 }
  0x5e   : > { %p2052_p6 = por %p2703_p4, %p58_p11  ;;  %s1345_s20 = sshll.u32 %s266_s19, 7 }
  0x5f   : > { %s46_s10 = ssub.s32 %s1852_s27, %s2737_s16  ;;  %s1402_s11 = sshll.u32 %s1848_s26, 4 }
  0x60   : > { %s48_s13 = sor.u32 %s47_s17, %s46_s10  ;;  %s1348_s30 = sshll.u32 %s1852_s27, 5 }
  0x61   : > { %p49_p13 = scmp.eq.s32.totalorder %s48_s13, 0  ;;  %s277_s21 = sadd.s32 %s1402_s11, %s1348_s30 }
  0x62   : > { %s270_s8 = scalar_lea.vmem [#allocation2], %s1345_s20  ;;  %s1349_s15 = sshll.u32 %s277_s21, 7 }
  0x63   : > { %s280_s1 = sshll.u32 %s270_s8, 4  ;;  %s2705_s0 = sld [smem:[#allocation22_spill]]  ;;  %s2067_s1 = int_to_ptr.vmem [resolvable:$true] %s280_s1 }
  0x64   : > { %s2065_s2 = scalar_select %p49_p13, %s1836_s23, %s51_s12  }
  0x65   : > { %p2078_p0 = pnand %p1494_p8, %p2046_p2  ;;  %s2082_s12 = scalar_lea.sflag [#allocation3], %s266_s19 }
  0x67   : > { %p1634_p5 = pneg %p2078_p0 }
  0x69   : > { %s2072_s6 = scalar_lea.hbm %s2705_s0, %s1349_s15  ;;  %s1637_s15 = scalar_lea.hbm %s2705_s0, 8192 }
  0x6a   : > { %s1632_s20 = scalar_lea.hbm %s2072_s6, 2048  ;;  %p1638_p12 = scmp.lt.u32.totalorder %s2072_s6, %s2705_s0 }
  0x6b   : > { %p1633_p3 = scmp.ne.s32.totalorder %s2072_s6, %s1632_s20  ;;  %p1639_p11 = scmp.lt.u32.totalorder %s1637_s15, %s1632_s20 }
  0x6c   : > { %p1641_p2 = scmp.lt.u32.totalorder %s1632_s20, %s2072_s6 }
  0x6d   : > { %p1635_p7 = pnand %p1634_p5, %p1633_p3  ;;  %p1640_p1 = por %p1639_p11, %p1638_p12 }
  0x6f   : > { %p1636_p9 = pneg %p1635_p7  ;;  %p1642_p10 = por %p1641_p2, %p1640_p1 }
  0x71   : > { %p1643_p4 = pnand %p1642_p10, %p1636_p9 }
  0x73   : > { %1646 = shalt.err (!%p1643_p4)
}
  0x74   : > { %s1647_s19 = scalar_lea.vmem %s2067_s1, 2048  ;;  %s1862_s13 = smov [#allocation2]  }
  0x75   : > { %p1648_p8 = scmp.ne.s32.totalorder %s2067_s1, %s1647_s19  ;;  %s1652_s11 = sshll.u32 %s1862_s13, 4  ;;  %s1653_s11 = int_to_ptr.vmem [resolvable:$false] %s1652_s11 }
  0x76   : > { %s1654_s30 = scalar_lea.vmem %s1653_s11, 4096  ;;  %p1655_p7 = scmp.lt.s32.totalorder %s2067_s1, %s1653_s11 }
  0x77   : > { %p1650_p13 = pnand %p1648_p8, %p1634_p5  ;;  %p1656_p12 = scmp.lt.s32.totalorder %s1654_s30, %s1647_s19 }
  0x79   : > { %p1651_p3 = pneg %p1650_p13  ;;  %p1657_p11 = por %p1656_p12, %p1655_p7 }
  0x7b   : > { %p1658_p1 = pnand %p1657_p11, %p1651_p3 }
  0x7d   : > { %1661 = shalt.err (!%p1658_p1)
}
  0x7e   : > { %s1863_s21 = smov 128   ;;  %s1864_s8 = smov 8  }
  0x7f   : > { %1478 = dma.hbm_to_vmem [thread:$0]  (!%p2078_p0), %s2072_s6, 2048, %s2067_s1, %s2082_s12, %s1863_s21, %s1863_s21, %s1864_s8  }
  0x80   : > { %p2707_p5 = scmp.ne.s32.totalorder %s2697_s9, 0 }
  0x81   : > { %s2113_s20 = sand.u32 (!%p2707_p5), 1, %s1832_s22   ;;  %p2708_p9 = scmp.ne.s32.totalorder (!%p2707_p5), %s2694_s7, 0 }
  0x82   : > { %292 = sbr.rel (%p2707_p5) target bundleno = 597 (0x255), region = 32  ;;  %s1351_s4 = sshll.u32 (!%p2707_p5), %s2113_s20, 7 }
  0x83   : > { %s295_s5 = scalar_lea.sflag (!%p2707_p5), [#allocation3], %s2113_s20  ;;  %s2117_s15 = scalar_lea.vmem (!%p2707_p5), [#allocation2], %s1351_s4 }
  0x89   : > { %1807 = dma.done.wait (%p2708_p9), %s295_s5, 2048  }
  0x8a   : > { %1809 = vsyncadd (%p2708_p9), %s295_s5, 4294965248  ;;  %p2709_p0 = scmp.eq.s32.totalorder %s1952_s29, 0 }
  0x8c   : > { %1811 = dma.done.wait (%p2709_p0), [#allocation6], 144   ;;  %p2710_p2 = pmov %p2709_p0 }
  0x8d   : > { %v1575_v0 = vld [vmem:[#allocation5] sm:$0xff]   ;;  %v355_v2 = vld [vmem:[%s2117_s15 + $0x8] sm:$0xff]  ;;  %vm393_vm0 = vcmask 130048   ;;  %v356_v6 = vld [vmem:[%s2117_s15 + $0x10] sm:$0xff]  ;;  %s2154_s1 = sshll.u32 %s2113_s20, 6  ;;  %vm579_vm1 = vcmask 27648   ;;  %v698_v58 = vlaneseq }
  0x8e   : > { %1813 = vsyncadd (%p2710_p2), [#allocation6], 4294967152  ;;  %v354_v1 = vld [vmem:[%s2117_s15] sm:$0xff]  ;;  %1430 = vmatprep.subr.bf16.mxu0 %v1575_v0  ;;  %1448 = vmatprep.subr.bf16.mxu1 %v1575_v0  ;;  %v363_v5 = vld [vmem:[%s2117_s15 + $0x48] sm:$0xff]  ;;  %v1865_v36 = vmov 1983009808  }
  0x8f   : > { %v362_v3 = vld [vmem:[%s2117_s15 + $0x40] sm:$0xff]  ;;  %v370_v4 = vpack.c.bf16 %v355_v2, %v354_v1  ;;  %v357_v7 = vld [vmem:[%s2117_s15 + $0x18] sm:$0xff]  ;;  %1431 = vmatpush3.bf16.msra.mxu0 %v1575_v0  ;;  %1449 = vmatpush3.bf16.msra.mxu1 %v1575_v0  ;;  %v364_v10 = vld [vmem:[%s2117_s15 + $0x50] sm:$0xff]  ;;  %v2160_v37 = vunpack.c.l.s4 %v1865_v36  ;;  %s2171_s6 = scalar_lea.vmem [#allocation8], %s2154_s1  ;;  %s1866_s7 = smov 124  }
  0x90   : > { %v374_v8 = vpack.c.bf16 %v363_v5, %v362_v3  ;;  %v371_v9 = vpack.c.bf16 %v357_v7, %v356_v6  ;;  %v365_v11 = vld [vmem:[%s2117_s15 + $0x58] sm:$0xff]  ;;  %v358_v12 = vld [vmem:[%s2117_s15 + $0x20] sm:$0xff]  ;;  %v359_v14 = vld [vmem:[%s2117_s15 + $0x28] sm:$0xff]  ;;  %s2311_s9 = scalar_lea.vmem [#allocation11], %s2154_s1  ;;  %s1419_s17 = sshll.u32 %s1840_s24, 4 }
  0x91   : > { %1432 = vmatprep.mubr.msk.bf16.mxu0 %vm393_vm0, %v370_v4  ;;  %v375_v13 = vpack.c.bf16 %v365_v11, %v364_v10  ;;  %v366_v15 = vld [vmem:[%s2117_s15 + $0x60] sm:$0xff]  ;;  %v367_v16 = vld [vmem:[%s2117_s15 + $0x68] sm:$0xff]  ;;  %v372_v17 = vpack.c.bf16 %v359_v14, %v358_v12  ;;  %v360_v19 = vld [vmem:[%s2117_s15 + $0x30] sm:$0xff]  ;;  %v697_v1 = vunpack.c.0.s8 %v2160_v37  ;;  %s1390_s12 = sshll.u32 %s1844_s25, 5  ;;  %s2711_s3 = sld [smem:[#allocation25_spill]] }
  0x92   : > { %1440 = vmatprep.mubr.msk.bf16.mxu1 %vm393_vm0, %v374_v8  ;;  %v376_v18 = vpack.c.bf16 %v367_v16, %v366_v15  ;;  %1433 = vmatmul.mubr.msk.bf16.vlgmr.msra.gmra.mrb[0].mxu0 %vm393_vm0, %v371_v9  ;;  %v361_v20 = vld [vmem:[%s2117_s15 + $0x38] sm:$0xff]  ;;  %v368_v21 = vld [vmem:[%s2117_s15 + $0x70] sm:$0xff]  ;;  %v2151_v25 = vld [vmem:[#allocation7] ss:$0 sm:$0xff]  ;;  %s2369_s18 = sadd.s32 %s1419_s17, %s1390_s12  ;;  %s1077_s30 = sshll.u32 %s2171_s6, 4  ;;  %s2388_s30 = int_to_ptr.vmem [resolvable:$true] %s1077_s30 }
  0x93   : > { %1441 = vmatmul.mubr.msk.bf16.vlgmr.msra.gmra.mrb[0].mxu1 %vm393_vm0, %v375_v13  ;;  %1436 = vmatprep.mubr.msk.bf16.mxu0 %vm393_vm0, %v372_v17  ;;  %v369_v22 = vld [vmem:[%s2117_s15 + $0x78] sm:$0xff]  ;;  %v373_v23 = vpack.c.bf16 %v361_v20, %v360_v19  ;;  %s1391_s10 = sshll.u32 %s2369_s18, 6  ;;  %s1046_s21 = scalar_lea.sflag [#allocation4], %s2113_s20 }
  0x94   : > { %1444 = vmatprep.mubr.msk.bf16.mxu1 %vm393_vm0, %v376_v18  ;;  %v377_v24 = vpack.c.bf16 %v369_v22, %v368_v21  ;;  %v699_v18 = vshrl.u32 %v698_v58, 7  ;;  %v1867_v21 = vmov 1934713408   ;;  %s1662_s8 = scalar_lea.vmem %s2388_s30, 1024  ;;  %s1869_s4 = smov [#allocation8]  }
  0x95   : > { %v728_v22 = vunpack.c.l.s4 %v1867_v21  ;;  %p1663_p10 = scmp.ne.s32.totalorder %s2388_s30, %s1662_s8  ;;  %s1666_s5 = sshll.u32 %s1869_s4, 4  ;;  %s1667_s5 = int_to_ptr.vmem [resolvable:$false] %s1666_s5 }
  0x96   : > { %v2266_v37 = vsub.s32 %v697_v1, %v699_v18  ;;  %s1668_s15 = scalar_lea.vmem %s1667_s5, 2048  ;;  %p1669_p13 = scmp.lt.s32.totalorder %s2388_s30, %s1667_s5 }
  0x97   : > { %s2383_s11 = scalar_lea.hbm %s2711_s3, %s1391_s10  ;;  %p1664_p4 = pnand %p1663_p10, %p2052_p6 }
  0x98   : > { %p1670_p3 = scmp.lt.s32.totalorder %s1668_s15, %s1662_s8 }
  0x99   : > { %p1665_p8 = pneg %p1664_p4 }
  0x9a   : > { %1437 = vmatmul.mubr.msk.bf16.gmra.mrb[4].mxu0 %vm393_vm0, %v373_v23  ;;  %p1671_p7 = por %p1670_p3, %p1669_p13 }
  0x9b   : > { %1445 = vmatmul.mubr.msk.bf16.gmra.mrb[4].mxu1 %vm393_vm0, %v377_v24 }
  0x9c   : > { %p1672_p12 = pnand %p1671_p7, %p1665_p8 }
 0x165   : > { %v1434_v26 = vpop.f32.mrb[0].mxu0 }
 0x166   : > { %v1442_v27 = vpop.f32.mrb[0].mxu1  ;;  %v461_v28 = vadd.f32 %v1434_v26, %v2151_v25  ;;  %v452_v30 = vpop.f32.mrb[1].mxu0 }
 0x167   : > { %v493_v29 = vadd.f32 %v1442_v27, %v2151_v25  ;;  %v484_v31 = vpop.f32.mrb[1].mxu1  ;;  %v453_v32 = vadd.f32 %v2151_v25, %v452_v30  ;;  %v1435_v34 = vpop.f32.mrb[2].mxu0 }
 0x168   : > { %v485_v33 = vadd.f32 %v2151_v25, %v484_v31  ;;  %v1443_v35 = vpop.f32.mrb[2].mxu1  ;;  %v464_v39 = vadd.f32 %v1435_v34, %v2151_v25  ;;  %v455_v41 = vpop.f32.mrb[3].mxu0  ;;  %v1405_v43 = vpack.c.bf16 %v461_v28, %v461_v28 }
 0x169   : > { %v2162_v38 = vpack.c.bf16 %v493_v29, %v493_v29  ;;  %v496_v40 = vadd.f32 %v1443_v35, %v2151_v25  ;;  %v487_v42 = vpop.f32.mrb[3].mxu1  ;;  %v1403_v44 = vpack.c.bf16 %v453_v32, %v453_v32  ;;  %v456_v46 = vadd.f32 %v2151_v25, %v455_v41 }
 0x16a   : > { %v2166_v45 = vpack.c.bf16 %v485_v33, %v485_v33  ;;  %v488_v47 = vadd.f32 %v2151_v25, %v487_v42  ;;  %v516_v48 = vpack.c.bf16 %v464_v39, %v461_v28  ;;  %v1406_v49 = vpack.c.bf16 %v464_v39, %v464_v39  ;;  %600 = vrot.lane.b32.xlu0 %v1405_v43, %s1866_s7 }
 0x16b   : > { %590 = vst.msk [vmem:[%s2171_s6 + $0x28] sm:$0xf] %vm579_vm1, %v2162_v38  ;;  %v520_v50 = vpack.c.bf16 %v496_v40, %v493_v29  ;;  %v2176_v51 = vpack.c.bf16 %v496_v40, %v496_v40  ;;  %582 = vst.msk [vmem:[%s2171_s6 + $0x8] sm:$0xf] %vm579_vm1, %v1405_v43  ;;  %v2186_v52 = vpack.c.bf16 %v456_v46, %v453_v32  ;;  %v729_v41 = vunpack.c.0.s8 %v728_v22 }
 0x16c   : > { %580 = vst.msk [vmem:[%s2171_s6] sm:$0xf] %vm579_vm1, %v1403_v44  ;;  %588 = vst.msk [vmem:[%s2171_s6 + $0x20] sm:$0xf] %vm579_vm1, %v2166_v45  ;;  %v1404_v53 = vpack.c.bf16 %v456_v46, %v456_v46  ;;  %v2188_v54 = vpack.c.bf16 %v488_v47, %v485_v33  ;;  %v2190_v55 = vpack.c.bf16 %v488_v47, %v488_v47  ;;  %v666_v56 = vshrl.u32 %v516_v48, 16 }
 0x16d   : > { %583 = vst.msk [vmem:[%s2171_s6 + $0xc] sm:$0xf] %vm579_vm1, %v1406_v49  ;;  %591 = vst.msk [vmem:[%s2171_s6 + $0x2c] sm:$0xf] %vm579_vm1, %v2176_v51  ;;  %v682_v57 = vshrl.u32 %v520_v50, 16  ;;  %855 = vrot.lane.b32.xlu1 %v520_v50, %s1866_s7  ;;  %v2201_v59 = vpack.i.b16 %v516_v48, %v2186_v52  ;;  %v665_v60 = vshrl.u32 %v2186_v52, 16 }
 0x16e   : > { %581 = vst.msk [vmem:[%s2171_s6 + $0x4] sm:$0xf] %vm579_vm1, %v1404_v53  ;;  %589 = vst.msk [vmem:[%s2171_s6 + $0x24] sm:$0xf] %vm579_vm1, %v2190_v55  ;;  %v2208_v61 = vpack.i.b16 %v520_v50, %v2188_v54  ;;  %v681_v62 = vshrl.u32 %v2188_v54, 16  ;;  %v1438_v63 = vpop.f32.mrb[4].mxu0  ;;  %596 = vrot.lane.b32.xlu0 %v1403_v44, %s1866_s7 }
 0x16f   : > { %v1446_v0 = vpop.f32.mrb[4].mxu1  ;;  %v477_v2 = vadd.f32 %v1438_v63, %v2151_v25  ;;  %v468_v4 = vpop.f32.mrb[5].mxu0  ;;  %v2215_v6 = vpack.i.b16 %v666_v56, %v665_v60  ;;  %v2288_v56 = vsub.s32 %v729_v41, %v699_v18 }
 0x170   : > { %v509_v3 = vadd.f32 %v1446_v0, %v2151_v25  ;;  %v500_v5 = vpop.f32.mrb[5].mxu1  ;;  %v2217_v7 = vpack.i.b16 %v682_v57, %v681_v62  ;;  %v693_v8 = vcombine.low %v2201_v59, %v2208_v61  ;;  %v694_v9 = vcombine.high %v2201_v59, %v2208_v61  ;;  %v1439_v10 = vpop.f32.mrb[6].mxu0 }
 0x171   : > { %v1447_v11 = vpop.f32.mrb[6].mxu1  ;;  %v2223_v12 = vpack.c.bf16 %v477_v2, %v477_v2  ;;  %v469_v14 = vadd.f32 %v2151_v25, %v468_v4  ;;  %v501_v15 = vadd.f32 %v2151_v25, %v500_v5  ;;  %602 = vrot.lane.b32.xlu1 %v1406_v49, %s1866_s7  ;;  %v471_v17 = vpop.f32.mrb[7].mxu0  ;;  %v480_v26 = vadd.f32 %v1439_v10, %v2151_v25 }
 0x172   : > { %v2225_v13 = vpack.c.bf16 %v509_v3, %v509_v3  ;;  %v503_v16 = vpop.f32.mrb[7].mxu1  ;;  %v761_v19 = vcombine.low %v2215_v6, %v2217_v7  ;;  %v762_v20 = vcombine.high %v2215_v6, %v2217_v7  ;;  %v512_v27 = vadd.f32 %v1447_v11, %v2151_v25  ;;  %847 = vrot.lane.b32.xlu0 %v516_v48, %s1866_s7 }
 0x173   : > { %586 = vst.msk [vmem:[%s2171_s6 + $0x18] sm:$0xf] %vm579_vm1, %v2223_v12  ;;  %v2240_v23 = vpack.c.bf16 %v469_v14, %v469_v14  ;;  %v2242_v24 = vpack.c.bf16 %v501_v15, %v501_v15  ;;  %v504_v28 = vadd.f32 %v2151_v25, %v503_v16  ;;  %v472_v29 = vadd.f32 %v2151_v25, %v471_v17 }
 0x174   : > { %594 = vst.msk [vmem:[%s2171_s6 + $0x38] sm:$0xf] %vm579_vm1, %v2225_v13  ;;  %v518_v30 = vpack.c.bf16 %v480_v26, %v477_v2  ;;  %v1410_v31 = vpack.c.bf16 %v480_v26, %v480_v26  ;;  %v522_v32 = vpack.c.bf16 %v512_v27, %v509_v3  ;;  %v2255_v33 = vpack.c.bf16 %v512_v27, %v512_v27 }
 0x175   : > { %584 = vst.msk [vmem:[%s2171_s6 + $0x10] sm:$0xf] %vm579_vm1, %v2240_v23  ;;  %592 = vst.msk [vmem:[%s2171_s6 + $0x30] sm:$0xf] %vm579_vm1, %v2242_v24  ;;  %598 = vrot.lane.b32.xlu1 %v1404_v53, %s1866_s7  ;;  %v2258_v34 = vpack.c.bf16 %v504_v28, %v501_v15  ;;  %v2260_v35 = vpack.c.bf16 %v504_v28, %v504_v28  ;;  %v2262_v25 = vpack.c.bf16 %v472_v29, %v469_v14  ;;  %v1868_v14 = vmov 0  }
 0x176   : > { %v2264_v36 = vpack.c.bf16 %v472_v29, %v472_v29  ;;  %587 = vst.msk [vmem:[%s2171_s6 + $0x1c] sm:$0xf] %vm579_vm1, %v1410_v31  ;;  %v674_v39 = vshrl.u32 %v518_v30, 16  ;;  %595 = vst.msk [vmem:[%s2171_s6 + $0x3c] sm:$0xf] %vm579_vm1, %v2255_v33  ;;  %v690_v40 = vshrl.u32 %v522_v32, 16  ;;  %845 = vrot.lane.b32.xlu0 %v2186_v52, %s1866_s7  ;;  %v701_v52 = vrot.slane %v693_v8, %v2266_v37 }
 0x177   : > { %593 = vst.msk [vmem:[%s2171_s6 + $0x34] sm:$0xf] %vm579_vm1, %v2260_v35  ;;  %v687_v42 = vpack.i.b16 %v522_v32, %v2258_v34  ;;  %v689_v43 = vshrl.u32 %v2258_v34, 16  ;;  %v671_v44 = vpack.i.b16 %v518_v30, %v2262_v25  ;;  %v673_v46 = vshrl.u32 %v2262_v25, 16 }
 0x178   : > { %585 = vst.msk [vmem:[%s2171_s6 + $0x14] sm:$0xf] %vm579_vm1, %v2264_v36  ;;  %v708_v53 = vrot.slane %v694_v9, %v2266_v37  ;;  %v769_v1 = vrot.slane %v761_v19, %v2266_v37  ;;  %v776_v2 = vrot.slane %v762_v20, %v2266_v37 }
 0x179   : > { %851 = vrot.lane.b32.xlu1 %v518_v30, %s1866_s7  ;;  %v691_v47 = vpack.i.b16 %v690_v40, %v689_v43  ;;  %v675_v48 = vpack.i.b16 %v674_v39, %v673_v46  ;;  %v709_v49 = vcombine.low %v671_v44, %v687_v42  ;;  %v710_v50 = vcombine.high %v671_v44, %v687_v42 }
 0x17a   : > { %853 = vrot.lane.b32.xlu0 %v2188_v54, %s1866_s7 }
 0x17b   : > { %v717_v57 = vrot.slane %v709_v49, %v2266_v37  ;;  %v724_v58 = vrot.slane %v710_v50, %v2266_v37  ;;  %v777_v59 = vcombine.low %v675_v48, %v691_v47  ;;  %v778_v60 = vcombine.high %v675_v48, %v691_v47 }
 0x17d   : > { %859 = vrot.lane.b32.xlu1 %v522_v32, %s1866_s7  ;;  %v725_v61 = vcombine.low %v701_v52, %v717_v57  ;;  %v726_v62 = vcombine.high %v701_v52, %v717_v57  ;;  %v741_v63 = vcombine.low %v708_v53, %v724_v58  ;;  %v742_v0 = vcombine.high %v708_v53, %v724_v58 }
 0x17e   : > { %v785_v3 = vrot.slane %v777_v59, %v2266_v37  ;;  %v792_v54 = vrot.slane %v778_v60, %v2266_v37  ;;  %608 = vrot.lane.b32.xlu0 %v2223_v12, %s1866_s7 }
 0x17f   : > { %v733_v4 = vrot.slane %v725_v61, %v2288_v56  ;;  %v740_v5 = vrot.slane %v726_v62, %v2288_v56  ;;  %v749_v6 = vrot.slane %v741_v63, %v2288_v56  ;;  %v756_v7 = vrot.slane %v742_v0, %v2288_v56 }
 0x180   : > { %v793_v8 = vcombine.low %v769_v1, %v785_v3  ;;  %v794_v9 = vcombine.high %v769_v1, %v785_v3  ;;  %v809_v10 = vcombine.low %v776_v2, %v792_v54  ;;  %v810_v11 = vcombine.high %v776_v2, %v792_v54 }
 0x181   : > { %610 = vrot.lane.b32.xlu1 %v1410_v31, %s1866_s7  ;;  %v757_v15 = vcombine.high %v733_v4, %v1868_v14  ;;  %v758_v16 = vcombine.high %v740_v5, %v1868_v14  ;;  %v759_v12 = vcombine.high %v749_v6, %v1868_v14  ;;  %v760_v17 = vcombine.high %v756_v7, %v1868_v14 }
 0x182   : > { %829 = vst.msk [vmem:[%s2311_s9] sm:$0xf] %vm579_vm1, %v733_v4  ;;  %833 = vst.msk [vmem:[%s2311_s9 + $0x10] sm:$0xf] %vm579_vm1, %v740_v5  ;;  %v801_v18 = vrot.slane %v793_v8, %v2288_v56  ;;  %v808_v19 = vrot.slane %v794_v9, %v2288_v56  ;;  %v817_v20 = vrot.slane %v809_v10, %v2288_v56  ;;  %604 = vrot.lane.b32.xlu0 %v2240_v23, %s1866_s7 }
 0x183   : > { %837 = vst.msk [vmem:[%s2311_s9 + $0x20] sm:$0xf] %vm579_vm1, %v749_v6  ;;  %841 = vst.msk [vmem:[%s2311_s9 + $0x30] sm:$0xf] %vm579_vm1, %v756_v7  ;;  %v824_v21 = vrot.slane %v810_v11, %v2288_v56 }
 0x184   : > { %831 = vst.msk [vmem:[%s2311_s9 + $0x8] sm:$0xf] %vm579_vm1, %v757_v15  ;;  %835 = vst.msk [vmem:[%s2311_s9 + $0x18] sm:$0xf] %vm579_vm1, %v758_v16  ;;  %v825_v22 = vcombine.high %v801_v18, %v1868_v14  ;;  %v826_v26 = vcombine.high %v808_v19, %v1868_v14  ;;  %v827_v27 = vcombine.high %v817_v20, %v1868_v14 }
 0x185   : > { %839 = vst.msk [vmem:[%s2311_s9 + $0x28] sm:$0xf] %vm579_vm1, %v759_v12  ;;  %843 = vst.msk [vmem:[%s2311_s9 + $0x38] sm:$0xf] %vm579_vm1, %v760_v17  ;;  %v828_v23 = vcombine.high %v824_v21, %v1868_v14  ;;  %849 = vrot.lane.b32.xlu1 %v2262_v25, %s1866_s7 }
 0x186   : > { %830 = vst.msk [vmem:[%s2311_s9 + $0x4] sm:$0xf] %vm579_vm1, %v801_v18  ;;  %834 = vst.msk [vmem:[%s2311_s9 + $0x14] sm:$0xf] %vm579_vm1, %v808_v19  ;;  %857 = vrot.lane.b32.xlu0 %v2258_v34, %s1866_s7 }
 0x187   : > { %838 = vst.msk [vmem:[%s2311_s9 + $0x24] sm:$0xf] %vm579_vm1, %v817_v20  ;;  %842 = vst.msk [vmem:[%s2311_s9 + $0x34] sm:$0xf] %vm579_vm1, %v824_v21 }
 0x188   : > { %832 = vst.msk [vmem:[%s2311_s9 + $0xc] sm:$0xf] %vm579_vm1, %v825_v22  ;;  %836 = vst.msk [vmem:[%s2311_s9 + $0x1c] sm:$0xf] %vm579_vm1, %v826_v26 }
 0x189   : > { %840 = vst.msk [vmem:[%s2311_s9 + $0x2c] sm:$0xf] %vm579_vm1, %v827_v27  ;;  %844 = vst.msk [vmem:[%s2311_s9 + $0x3c] sm:$0xf] %vm579_vm1, %v828_v23  ;;  %614 = vrot.lane.b32.xlu1 %v2190_v55, %s1866_s7 }
 0x18a   : > { %612 = vrot.lane.b32.xlu0 %v2166_v45, %s1866_s7 }
 0x18d   : > { %618 = vrot.lane.b32.xlu1 %v2176_v51, %s1866_s7 }
 0x18e   : > { %616 = vrot.lane.b32.xlu0 %v2162_v38, %s1866_s7 }
 0x191   : > { %606 = vrot.lane.b32.xlu1 %v2264_v36, %s1866_s7 }
 0x192   : > { %620 = vrot.lane.b32.xlu0 %v2242_v24, %s1866_s7 }
 0x195   : > { %622 = vrot.lane.b32.xlu1 %v2260_v35, %s1866_s7 }
 0x196   : > { %1675 = shalt.err (!%p1672_p12)
}
 0x197   : > { %s1676_s6 = scalar_lea.hbm %s2383_s11, 1024  ;;  %s1680_s13 = scalar_lea.hbm %s2711_s3, 4096 }
 0x198   : > { %p1677_p11 = scmp.ne.s32.totalorder %s2383_s11, %s1676_s6  ;;  %p1681_p9 = scmp.lt.u32.totalorder %s2383_s11, %s2711_s3 }
 0x199   : > { %p1682_p0 = scmp.lt.u32.totalorder %s1680_s13, %s1676_s6  ;;  %p1684_p10 = scmp.lt.u32.totalorder %s1676_s6, %s2383_s11 }
 0x19a   : > { %p1678_p1 = pnand %p1677_p11, %p2052_p6 }
 0x19b   : > { %p1683_p2 = por %p1682_p0, %p1681_p9 }
 0x19c   : > { %p1679_p5 = pneg %p1678_p1 }
 0x19d   : > { %p1685_p4 = por %p1684_p10, %p1683_p2 }
 0x19f   : > { %p1686_p8 = pnand %p1685_p4, %p1679_p5 }
 0x1a1   : > { %1689 = shalt.err (!%p1686_p8)
}
 0x1a2   : > { %s2683_s8 = smov 64   ;;  %s1871_s15 = smov 4   ;;  %624 = vrot.lane.b32.xlu0 %v2225_v13, %s1866_s7  ;;  %626 = vrot.lane.b32.xlu1 %v2255_v33, %s1866_s7  ;;  %vm644_vm2 = vcmask 125952  }
 0x1a3   : > { %1460 = dma.vmem_to_hbm [thread:$0]  (%p2052_p6), %s2388_s30, 1024, %s2383_s11, %s1046_s21, %s2683_s8, %s2683_s8, %s1871_s15  }
 0x1a4   : > { %s2422_s6 = scalar_lea.vmem [#allocation9], %s2154_s1  ;;  %s2451_s7 = sadd.s32 %s1840_s24, %s1390_s12 }
 0x1a5   : > { %s2682_s24 = sshll.u32 %s2451_s7, 6  ;;  %s2469_s25 = scalar_lea.vmem [#allocation12], %s2154_s1 }
 0x1a6   : > { %s1130_s1 = sshll.u32 %s2469_s25, 4  ;;  %s1096_s11 = sshll.u32 %s2422_s6, 4  ;;  %s2517_s1 = int_to_ptr.vmem [resolvable:$true] %s1130_s1  ;;  %s2537_s11 = int_to_ptr.vmem [resolvable:$true] %s1096_s11 }
 0x1a7   : > { %s2712_s17 = sld [smem:[#allocation28_spill]]  ;;  %s2713_s30 = sld [smem:[#allocation26_spill]] }
 0x1a8   : > { %s1061_s12 = scalar_lea.sflag [#allocation13], %s2113_s20  ;;  %s1690_s13 = scalar_lea.vmem %s2517_s1, 1024 }
 0x1a9   : > { %p1691_p13 = scmp.ne.s32.totalorder %s2517_s1, %s1690_s13 }
 0x1ab   : > { %p1692_p3 = pnand %p1691_p13, %p2052_p6 }
 0x1ad   : > { %s2503_s19 = scalar_lea.hbm %s2712_s17, %s2682_s24  ;;  %s2535_s21 = scalar_lea.hbm %s2713_s30, %s1391_s10 }
 0x1ae   : > { %p1693_p7 = pneg %p1692_p3  ;;  %s1872_s24 = smov [#allocation12]  }
 0x1af   : > { %s1694_s8 = sshll.u32 %s1872_s24, 4  ;;  %s1695_s8 = int_to_ptr.vmem [resolvable:$false] %s1694_s8 }
 0x1b0   : > { %p1697_p12 = scmp.lt.s32.totalorder %s2517_s1, %s1695_s8 }
 0x1dc   : > { %v601_v38 = vpop.permute.xlu0 %600 }
 0x1dd   : > { %647 = vst.msk [vmem:[%s2422_s6 + $0x8] sm:$0xf] %vm644_vm2, %v601_v38 }
 0x1df   : > { %v856_v45 = vpop.permute.xlu1 %855 }
 0x1e0   : > { %v597_v51 = vpop.permute.xlu0 %596  ;;  %v882_v36 = vshrl.u32 %v856_v45, 16 }
 0x1e1   : > { %645 = vst.msk [vmem:[%s2422_s6] sm:$0xf] %vm644_vm2, %v597_v51 }
 0x1e3   : > { %v603_v55 = vpop.permute.xlu1 %602 }
 0x1e4   : > { %648 = vst.msk [vmem:[%s2422_s6 + $0xc] sm:$0xf] %vm644_vm2, %v603_v55  ;;  %v848_v13 = vpop.permute.xlu0 %847 }
 0x1e5   : > { %v866_v42 = vshrl.u32 %v848_v13, 16 }
 0x1e7   : > { %v599_v24 = vpop.permute.xlu1 %598 }
 0x1e8   : > { %646 = vst.msk [vmem:[%s2422_s6 + $0x4] sm:$0xf] %vm644_vm2, %v599_v24  ;;  %v846_v28 = vpop.permute.xlu0 %845 }
 0x1e9   : > { %v863_v39 = vpack.i.b16 %v848_v13, %v846_v28  ;;  %v865_v40 = vshrl.u32 %v846_v28, 16 }
 0x1eb   : > { %v852_v29 = vpop.permute.xlu1 %851  ;;  %v867_v58 = vpack.i.b16 %v866_v42, %v865_v40 }
 0x1ec   : > { %v854_v30 = vpop.permute.xlu0 %853  ;;  %v874_v44 = vshrl.u32 %v852_v29, 16 }
 0x1ed   : > { %v879_v34 = vpack.i.b16 %v856_v45, %v854_v30  ;;  %v881_v35 = vshrl.u32 %v854_v30, 16 }
 0x1ef   : > { %v860_v31 = vpop.permute.xlu1 %859  ;;  %v883_v46 = vpack.i.b16 %v882_v36, %v881_v35  ;;  %v893_v47 = vcombine.low %v863_v39, %v879_v34  ;;  %v894_v48 = vcombine.high %v863_v39, %v879_v34 }
 0x1f0   : > { %v609_v32 = vpop.permute.xlu0 %608  ;;  %v890_v50 = vshrl.u32 %v860_v31, 16 }
 0x1f1   : > { %651 = vst.msk [vmem:[%s2422_s6 + $0x18] sm:$0xf] %vm644_vm2, %v609_v32  ;;  %v901_v0 = vrot.slane %v893_v47, %v2266_v37  ;;  %v908_v1 = vrot.slane %v894_v48, %v2266_v37  ;;  %v961_v2 = vcombine.low %v867_v58, %v883_v46  ;;  %v962_v3 = vcombine.high %v867_v58, %v883_v46 }
 0x1f3   : > { %v611_v33 = vpop.permute.xlu1 %610  ;;  %v969_v16 = vrot.slane %v961_v2, %v2266_v37  ;;  %v976_v12 = vrot.slane %v962_v3, %v2266_v37 }
 0x1f4   : > { %652 = vst.msk [vmem:[%s2422_s6 + $0x1c] sm:$0xf] %vm644_vm2, %v611_v33  ;;  %v605_v25 = vpop.permute.xlu0 %604 }
 0x1f5   : > { %649 = vst.msk [vmem:[%s2422_s6 + $0x10] sm:$0xf] %vm644_vm2, %v605_v25 }
 0x1f7   : > { %v850_v41 = vpop.permute.xlu1 %849 }
 0x1f8   : > { %v873_v43 = vshrl.u32 %v850_v41, 16  ;;  %v858_v49 = vpop.permute.xlu0 %857  ;;  %v871_v52 = vpack.i.b16 %v852_v29, %v850_v41 }
 0x1f9   : > { %v887_v53 = vpack.i.b16 %v860_v31, %v858_v49  ;;  %v889_v57 = vshrl.u32 %v858_v49, 16 }
 0x1fa   : > { %v875_v60 = vpack.i.b16 %v874_v44, %v873_v43 }
 0x1fb   : > { %v615_v59 = vpop.permute.xlu1 %614  ;;  %v891_v61 = vpack.i.b16 %v890_v50, %v889_v57  ;;  %v909_v62 = vcombine.low %v871_v52, %v887_v53  ;;  %v910_v63 = vcombine.high %v871_v52, %v887_v53 }
 0x1fc   : > { %654 = vst.msk [vmem:[%s2422_s6 + $0x24] sm:$0xf] %vm644_vm2, %v615_v59  ;;  %v613_v54 = vpop.permute.xlu0 %612 }
 0x1fd   : > { %v917_v4 = vrot.slane %v909_v62, %v2266_v37  ;;  %v924_v5 = vrot.slane %v910_v63, %v2266_v37  ;;  %v977_v6 = vcombine.low %v875_v60, %v891_v61  ;;  %v978_v7 = vcombine.high %v875_v60, %v891_v61  ;;  %653 = vst.msk [vmem:[%s2422_s6 + $0x20] sm:$0xf] %vm644_vm2, %v613_v54 }
 0x1ff   : > { %v619_v8 = vpop.permute.xlu1 %618  ;;  %v925_v9 = vcombine.low %v901_v0, %v917_v4  ;;  %v926_v10 = vcombine.high %v901_v0, %v917_v4  ;;  %v941_v11 = vcombine.low %v908_v1, %v924_v5  ;;  %v942_v15 = vcombine.high %v908_v1, %v924_v5 }
 0x200   : > { %656 = vst.msk [vmem:[%s2422_s6 + $0x2c] sm:$0xf] %vm644_vm2, %v619_v8  ;;  %v985_v17 = vrot.slane %v977_v6, %v2266_v37  ;;  %v992_v18 = vrot.slane %v978_v7, %v2266_v37  ;;  %v617_v19 = vpop.permute.xlu0 %616 }
 0x201   : > { %v933_v20 = vrot.slane %v925_v9, %v2288_v56  ;;  %v940_v21 = vrot.slane %v926_v10, %v2288_v56  ;;  %v949_v22 = vrot.slane %v941_v11, %v2288_v56  ;;  %v956_v26 = vrot.slane %v942_v15, %v2288_v56  ;;  %655 = vst.msk [vmem:[%s2422_s6 + $0x28] sm:$0xf] %vm644_vm2, %v617_v19 }
 0x202   : > { %v993_v27 = vcombine.low %v969_v16, %v985_v17  ;;  %v994_v23 = vcombine.high %v969_v16, %v985_v17  ;;  %v1009_v38 = vcombine.low %v976_v12, %v992_v18  ;;  %v1010_v45 = vcombine.high %v976_v12, %v992_v18 }
 0x203   : > { %v607_v51 = vpop.permute.xlu1 %606  ;;  %v957_v37 = vcombine.high %v933_v20, %v1868_v14  ;;  %v958_v55 = vcombine.high %v940_v21, %v1868_v14  ;;  %v959_v13 = vcombine.high %v949_v22, %v1868_v14  ;;  %v960_v24 = vcombine.high %v956_v26, %v1868_v14  ;;  %1029 = vst.msk [vmem:[%s2469_s25] sm:$0xf] %vm644_vm2, %v933_v20 }
 0x204   : > { %1033 = vst.msk [vmem:[%s2469_s25 + $0x10] sm:$0xf] %vm644_vm2, %v940_v21  ;;  %1037 = vst.msk [vmem:[%s2469_s25 + $0x20] sm:$0xf] %vm644_vm2, %v949_v22  ;;  %v1001_v28 = vrot.slane %v993_v27, %v2288_v56  ;;  %v1008_v29 = vrot.slane %v994_v23, %v2288_v56  ;;  %v1017_v30 = vrot.slane %v1009_v38, %v2288_v56  ;;  %v621_v32 = vpop.permute.xlu0 %620 }
 0x205   : > { %1041 = vst.msk [vmem:[%s2469_s25 + $0x30] sm:$0xf] %vm644_vm2, %v956_v26  ;;  %650 = vst.msk [vmem:[%s2422_s6 + $0x14] sm:$0xf] %vm644_vm2, %v607_v51  ;;  %v1024_v31 = vrot.slane %v1010_v45, %v2288_v56 }
 0x206   : > { %1031 = vst.msk [vmem:[%s2469_s25 + $0x8] sm:$0xf] %vm644_vm2, %v957_v37  ;;  %1035 = vst.msk [vmem:[%s2469_s25 + $0x18] sm:$0xf] %vm644_vm2, %v958_v55  ;;  %v1025_v56 = vcombine.high %v1001_v28, %v1868_v14  ;;  %v1026_v33 = vcombine.high %v1008_v29, %v1868_v14  ;;  %v1027_v34 = vcombine.high %v1017_v30, %v1868_v14 }
 0x207   : > { %1039 = vst.msk [vmem:[%s2469_s25 + $0x28] sm:$0xf] %vm644_vm2, %v959_v13  ;;  %1043 = vst.msk [vmem:[%s2469_s25 + $0x38] sm:$0xf] %vm644_vm2, %v960_v24  ;;  %v1028_v35 = vcombine.high %v1024_v31, %v1868_v14  ;;  %v623_v25 = vpop.permute.xlu1 %622 }
 0x208   : > { %657 = vst.msk [vmem:[%s2422_s6 + $0x30] sm:$0xf] %vm644_vm2, %v621_v32  ;;  %1030 = vst.msk [vmem:[%s2469_s25 + $0x4] sm:$0xf] %vm644_vm2, %v1001_v28 }
 0x209   : > { %1034 = vst.msk [vmem:[%s2469_s25 + $0x14] sm:$0xf] %vm644_vm2, %v1008_v29  ;;  %1038 = vst.msk [vmem:[%s2469_s25 + $0x24] sm:$0xf] %vm644_vm2, %v1017_v30 }
 0x20a   : > { %1042 = vst.msk [vmem:[%s2469_s25 + $0x34] sm:$0xf] %vm644_vm2, %v1024_v31  ;;  %658 = vst.msk [vmem:[%s2422_s6 + $0x34] sm:$0xf] %vm644_vm2, %v623_v25 }
 0x20b   : > { %1032 = vst.msk [vmem:[%s2469_s25 + $0xc] sm:$0xf] %vm644_vm2, %v1025_v56  ;;  %1036 = vst.msk [vmem:[%s2469_s25 + $0x1c] sm:$0xf] %vm644_vm2, %v1026_v33 }
 0x20c   : > { %1040 = vst.msk [vmem:[%s2469_s25 + $0x2c] sm:$0xf] %vm644_vm2, %v1027_v34  ;;  %1044 = vst.msk [vmem:[%s2469_s25 + $0x3c] sm:$0xf] %vm644_vm2, %v1028_v35  ;;  %s1696_s25 = scalar_lea.vmem %s1695_s8, 2048 }
 0x20d   : > { %p1698_p11 = scmp.lt.s32.totalorder %s1696_s25, %s1690_s13 }
 0x20f   : > { %p1699_p1 = por %p1698_p11, %p1697_p12 }
 0x211   : > { %p1700_p5 = pnand %p1699_p1, %p1693_p7 }
 0x214   : > { %v625_v14 = vpop.permute.xlu0 %624 }
 0x215   : > { %659 = vst.msk [vmem:[%s2422_s6 + $0x38] sm:$0xf] %vm644_vm2, %v625_v14 }
 0x216   : > { %1703 = shalt.err (!%p1700_p5)
}
 0x217   : > { %s1704_s18 = scalar_lea.hbm %s2503_s19, 1024  ;;  %s1708_s24 = scalar_lea.hbm %s2712_s17, 4096 }
 0x218   : > { %p1705_p9 = scmp.ne.s32.totalorder %s2503_s19, %s1704_s18  ;;  %p1709_p10 = scmp.lt.u32.totalorder %s2503_s19, %s2712_s17 }
 0x219   : > { %p1710_p4 = scmp.lt.u32.totalorder %s1708_s24, %s1704_s18  ;;  %p1712_p13 = scmp.lt.u32.totalorder %s1704_s18, %s2503_s19 }
 0x21a   : > { %p1706_p0 = pnand %p1705_p9, %p2052_p6 }
 0x21b   : > { %p1711_p8 = por %p1710_p4, %p1709_p10 }
 0x21c   : > { %p1707_p2 = pneg %p1706_p0 }
 0x21d   : > { %p1713_p3 = por %p1712_p13, %p1711_p8 }
 0x21f   : > { %p1714_p7 = pnand %p1713_p3, %p1707_p2 }
 0x221   : > { %1717 = shalt.err (!%p1714_p7)
}
 0x222   : > { %s1873_s13 = smov 128   ;;  %s2714_s25 = smov 64   ;;  %v627_v36 = vpop.permute.xlu1 %626 }
 0x223   : > { %1463 = dma.vmem_to_hbm [thread:$0]  (%p2052_p6), %s2517_s1, 1024, %s2503_s19, %s1061_s12, %s2714_s25, %s1873_s13, %s1871_s15  }
 0x224   : > { %s2715_s18 = sshll.u32 %s2451_s7, 6  ;;  %s2716_s24 = sld [smem:[#allocation27_spill]]  ;;  %660 = vst.msk [vmem:[%s2422_s6 + $0x3c] sm:$0xf] %vm644_vm2, %v627_v36 }
 0x225   : > { %s2718_s0 = sshll.u32 %s2311_s9, 4  ;;  %s2719_s20 = sand.u32 1, %s1952_s29   ;;  %s2577_s0 = int_to_ptr.vmem [resolvable:$true] %s2718_s0 }
 0x226   : > { %s2583_s3 = scalar_lea.sflag [#allocation10], %s2719_s20  ;;  %s1718_s17 = scalar_lea.vmem %s2537_s11, 1024 }
 0x227   : > { %p1719_p12 = scmp.ne.s32.totalorder %s2537_s11, %s1718_s17  ;;  %s1874_s1 = smov [#allocation9]  }
 0x228   : > { %s1722_s7 = sshll.u32 %s1874_s1, 4  ;;  %s1723_s7 = int_to_ptr.vmem [resolvable:$false] %s1722_s7 }
 0x229   : > { %p1720_p11 = pnand %p1719_p12, %p2052_p6  ;;  %s1724_s12 = scalar_lea.vmem %s1723_s7, 2048 }
 0x22a   : > { %s2717_s5 = smov %s2716_s24  ;;  %s2573_s8 = scalar_lea.hbm %s2716_s24, %s2715_s18 }
 0x22b   : > { %p1721_p1 = pneg %p1720_p11  ;;  %p1725_p5 = scmp.lt.s32.totalorder %s2537_s11, %s1723_s7 }
 0x22c   : > { %p1726_p9 = scmp.lt.s32.totalorder %s1724_s12, %s1718_s17 }
 0x22e   : > { %p1727_p0 = por %p1726_p9, %p1725_p5 }
 0x230   : > { %p1728_p2 = pnand %p1727_p0, %p1721_p1 }
 0x232   : > { %1731 = shalt.err (!%p1728_p2)
}
 0x233   : > { %s1732_s29 = scalar_lea.hbm %s2535_s21, 1024  ;;  %s1736_s19 = scalar_lea.hbm %s2713_s30, 4096 }
 0x234   : > { %p1733_p10 = scmp.ne.s32.totalorder %s2535_s21, %s1732_s29  ;;  %p1737_p13 = scmp.lt.u32.totalorder %s2535_s21, %s2713_s30 }
 0x235   : > { %p1738_p3 = scmp.lt.u32.totalorder %s1736_s19, %s1732_s29  ;;  %p1740_p12 = scmp.lt.u32.totalorder %s1732_s29, %s2535_s21 }
 0x236   : > { %p1734_p4 = pnand %p1733_p10, %p2052_p6 }
 0x237   : > { %p1739_p7 = por %p1738_p3, %p1737_p13 }
 0x238   : > { %p1735_p8 = pneg %p1734_p4 }
 0x239   : > { %p1741_p11 = por %p1740_p12, %p1739_p7 }
 0x23b   : > { %p1742_p1 = pnand %p1741_p11, %p1735_p8 }
 0x23d   : > { %1745 = shalt.err (!%p1742_p1)
}
 0x23e   : > { %1461 = dma.vmem_to_hbm [thread:$0]  (%p2052_p6), %s2537_s11, 1024, %s2535_s21, %s2583_s3, %s2714_s25, %s2714_s25, %s1871_s15  }
 0x23f   : > { %s1746_s17 = scalar_lea.vmem %s2577_s0, 1024  ;;  %s1875_s4 = smov [#allocation11]  }
 0x240   : > { %p1747_p5 = scmp.ne.s32.totalorder %s2577_s0, %s1746_s17  ;;  %s1750_s24 = sshll.u32 %s1875_s4, 4  ;;  %s1751_s24 = int_to_ptr.vmem [resolvable:$false] %s1750_s24 }
 0x241   : > { %s1752_s20 = scalar_lea.vmem %s1751_s24, 2048  ;;  %p1753_p2 = scmp.lt.s32.totalorder %s2577_s0, %s1751_s24 }
 0x242   : > { %p1748_p9 = pnand %p1747_p5, %p2052_p6  ;;  %p1754_p10 = scmp.lt.s32.totalorder %s1752_s20, %s1746_s17 }
 0x244   : > { %p1749_p0 = pneg %p1748_p9  ;;  %p1755_p4 = por %p1754_p10, %p1753_p2 }
 0x246   : > { %p1756_p8 = pnand %p1755_p4, %p1749_p0 }
 0x248   : > { %1759 = shalt.err (!%p1756_p8)
}
 0x249   : > { %s1760_s11 = scalar_lea.hbm %s2573_s8, 1024  ;;  %s1764_s7 = scalar_lea.hbm %s2717_s5, 4096 }
 0x24a   : > { %p1761_p13 = scmp.ne.s32.totalorder %s2573_s8, %s1760_s11  ;;  %p1765_p12 = scmp.lt.u32.totalorder %s2573_s8, %s2717_s5 }
 0x24b   : > { %p1766_p11 = scmp.lt.u32.totalorder %s1764_s7, %s1760_s11  ;;  %p1768_p5 = scmp.lt.u32.totalorder %s1760_s11, %s2573_s8 }
 0x24c   : > { %p1762_p3 = pnand %p1761_p13, %p2052_p6 }
 0x24d   : > { %p1767_p1 = por %p1766_p11, %p1765_p12 }
 0x24e   : > { %p1763_p7 = pneg %p1762_p3 }
 0x24f   : > { %p1769_p9 = por %p1768_p5, %p1767_p1 }
 0x251   : > { %p1770_p0 = pnand %p1769_p9, %p1763_p7 }
 0x253   : > { %1773 = shalt.err (!%p1770_p0)
}
 0x254   : > { %1462 = dma.vmem_to_hbm [thread:$0]  (%p2052_p6), %s2577_s0, 1024, %s2573_s8, %s2583_s3, %s2714_s25, %s1873_s13, %s1871_s15  }
 0x255 PF: > { %s2720_s9 = sld [smem:[#allocation19_spill]]  ;;  %s2721_s6 = sld [smem:[#allocation20_spill]] }
 0x256   : > { %p1497_p2 = scmp.ge.s32.totalorder %s1856_s28, 2 }
 0x25b   : > { %s1145_s19 = sand.u32 1, %s2720_s9   ;;  %p2722_p10 = scmp.ne.s32.totalorder %s2721_s6, 0 }
 0x25c   : > { %s1146_s18 = scalar_lea.sflag [#allocation4], %s1145_s19 }
 0x25d   : > { %p1480_p4 = pnand %p1497_p2, %p2722_p10 }
 0x25f   : > { %1815 = dma.done.wait (!%p1480_p4), %s1146_s18, 1024  }
 0x260   : > { %1817 = vsyncadd (!%p1480_p4), %s1146_s18, 4294966272  ;;  %s2723_s14 = sadd.s32 4294967294, %s1856_s28  }
 0x261   : > { %s1154_s10 = sand.u32 1, %s2723_s14  }
 0x262   : > { %s1155_s17 = scalar_lea.sflag [#allocation10], %s1154_s10 }
 0x263   : > { %1819 = dma.done.wait (!%p1480_p4), %s1155_s17, 2048  }
 0x264   : > { %1821 = vsyncadd (!%p1480_p4), %s1155_s17, 4294965248  ;;  %s1173_s4 = scalar_lea.sflag [#allocation13], %s1145_s19 }
 0x265   : > { %1823 = dma.done.wait (!%p1480_p4), %s1173_s4, 1024  }
 0x266   : > { %1825 = vsyncadd (!%p1480_p4), %s1173_s4, 4294966272  ;;  %s30_s28 = sadd.s32 1, %s1856_s28   ;;  %s2724_s0 = sld [smem:[#allocation21_spill]] }
 0x267   : > { %p27_p6 = scmp.ge.s32.totalorder %s30_s28, 6   ;;  %s2725_s21 = smov %s1832_s22 }
 0x268   : > { %s2726_s22 = smov %s1836_s23  ;;  %s2727_s23 = smov %s2065_s2 }
 0x269   : > { %s2728_s24 = smov %s1848_s26  ;;  %s2729_s25 = smov %s1852_s27 }
 0x26a   : > { %s2731_s27 = smov %s2737_s16  ;;  %29 = sbr.rel (!%p27_p6) target bundleno = 20 (0x14), region = 134 }
 0x26c   : > { %s2730_s26 = smov %s2724_s0 }
 0x271   :  { %1178 = vsyncpa [#allocation3], 1 }
 0x272   :  { %1180 = vsyncpa [#allocation3 + $0x1], 1 }
 0x273   :  { %1181 = vsyncpa [#allocation6], 1 }
 0x274   :  { %1182 = vsyncpa [#allocation4], 1 }
 0x275   :  { %1184 = vsyncpa [#allocation4 + $0x1], 1 }
 0x276   :  { %1185 = vsyncpa [#allocation10], 1 }
 0x277   :  { %1187 = vsyncpa [#allocation10 + $0x1], 1 }
 0x278   :  { %1188 = vsyncpa [#allocation13], 1 }
 0x279   :  { %1190 = vsyncpa [#allocation13 + $0x1], 1 }

</bundles_post_ra>
